<compile_context>
chip_gen: v7x
topology: tpu7x:2x2x1
jax: 0.10.0
libtpu: 0.0.40
codegen_flags: <defaults>
</compile_context>

<pallas_src>
import numpy as np
import jax
import jax.numpy as jnp
from jax.experimental import pallas as pl
from jax.experimental.pallas import tpu as pltpu

BN_EPS = 1e-5


# --------------------------------------------------------------------------
# Tile / VMEM sizing helpers
# --------------------------------------------------------------------------
def _round_up(x, m):
    return (x + m - 1) // m * m


def _vmem_budget_bytes():
    """~75% of physical per-core VMEM, capped at 96 MiB.
    v5e/v6e (128 MiB) -> 96 MiB, v7x (64 MiB) -> 48 MiB.
    Falls back to a conservative 48 MiB if the query fails."""
    try:
        cap = int(pltpu.get_tpu_info().vmem_capacity_bytes)
    except Exception:
        cap = 64 * 1024 * 1024
    return min(int(cap * 0.75), 96 * 1024 * 1024)


def _choose_tile(hw, bytes_per_pixel, vmem_budget, max_tile=8192):
    """Pick the pixel tile from the VMEM budget.

    Returns (tile, hw_pad): tile is a multiple of 128 dividing hw_pad, sized so
    ~80% of the budget covers the double-buffered tiles + f32 intermediates."""
    hw128 = _round_up(hw, 128)
    cap = max(128, (int(vmem_budget * 0.8) // max(bytes_per_pixel, 1)) // 128 * 128)
    if hw128 <= cap:
        return hw128, hw128                      # one tile covers all pixels
    cap = min(cap, max_tile)
    n = hw128 // 128
    best = 128
    for d in range(1, n + 1):                    # largest 128-multiple divisor <= cap
        if n % d == 0 and d * 128 <= cap:
            best = d * 128
    return best, hw128


# --------------------------------------------------------------------------
# Pass 1: per-batch per-channel sum / sum-of-squares of x1 = Wx@x, g1 = Wg@g
# --------------------------------------------------------------------------
def _stats_kernel(x_ref, g_ref, wx_ref, wg_ref,
                  sx_ref, sxx_ref, sg_ref, sgg_ref):
    # Per-batch accumulators: initialize on the first pixel tile of each batch.
    @pl.when(pl.program_id(1) == 0)
    def _init():
        sx_ref[...] = jnp.zeros_like(sx_ref)
        sxx_ref[...] = jnp.zeros_like(sxx_ref)
        sg_ref[...] = jnp.zeros_like(sg_ref)
        sgg_ref[...] = jnp.zeros_like(sgg_ref)

    x = x_ref[...]                                   # (Cin, T) pixels on lanes
    g = g_ref[...]                                   # (Cg,  T)

    # 1x1 convs; bias dropped (cancels exactly with the BN mean subtraction).
    x1 = jnp.dot(wx_ref[...], x, preferred_element_type=jnp.float32)   # (Ci, T)
    g1 = jnp.dot(wg_ref[...], g, preferred_element_type=jnp.float32)   # (Ci, T)

    sx_ref[...] += jnp.sum(x1, axis=1, keepdims=True)
    sxx_ref[...] += jnp.sum(x1 * x1, axis=1, keepdims=True)
    sg_ref[...] += jnp.sum(g1, axis=1, keepdims=True)
    sgg_ref[...] += jnp.sum(g1 * g1, axis=1, keepdims=True)


# --------------------------------------------------------------------------
# Pass 2: fused (conv + folded BN) x2 -> ReLU -> psi -> sigmoid -> gate
# --------------------------------------------------------------------------
def _apply_kernel(x_ref, g_ref, wx_ref, wg_ref, b_ref,
                  psi_w_ref, psi_b_ref, out_ref):
    x = x_ref[...]                                   # (Cin, T) input dtype
    g = g_ref[...]                                   # (Cg,  T)

    # BN scale folded into the weights on host; both shifts merged into b_ref.
    # Two MXU pushes share one f32 accumulator -> no per-tile scale/shift VPU work.
    y = jnp.dot(wx_ref[...], x, preferred_element_type=jnp.float32)     # (Ci, T)
    y = y + jnp.dot(wg_ref[...], g, preferred_element_type=jnp.float32)
    y = jnp.maximum(y + b_ref[...], 0.0)                                 # ReLU

    # psi: width-1 1x1 conv as a sublane (channel) reduction, not an MXU matmul.
    psi = jnp.sum(y * psi_w_ref[...], axis=0, keepdims=True) + psi_b_ref[...]
    att = jax.nn.sigmoid(psi)                                            # (1, T)

    out_ref[...] = (x.astype(jnp.float32) * att).astype(out_ref.dtype)


# --------------------------------------------------------------------------
# Wrapper
# --------------------------------------------------------------------------
def attention_gate(x, g, params):
    """x: (N, Cin, H, W), g: (N, Cg, H, W) -> (N, Cin, H, W)."""
    N, Cin, H, W = x.shape
    Cg = g.shape[1]
    Ci = params["w_x"].shape[0]
    HW = H * W
    P = N * HW                                       # true pixel count for BN stats

    # bf16 inputs feed the native bf16 MXU; f32 inputs stay on the f32 path.
    in_dt = jnp.dtype(x.dtype)
    mxu_dt = jnp.bfloat16 if in_dt == jnp.dtype(jnp.bfloat16) else jnp.float32
    in_b = in_dt.itemsize

    # VMEM-budget-driven pixel tile: double-buffered x/g/out tiles + f32 temps.
    vmem_budget = _vmem_budget_bytes()
    bytes_per_pixel = 2 * (Cin + Cg + Cin) * in_b + 4 * (2 * Ci + Cin + Cg)
    tile, HWp = _choose_tile(HW, bytes_per_pixel, vmem_budget)
    T = HWp // tile

    # NCHW -> (N, C, H*W): pure reshape, no HBM transpose passes.  Zero-padding
    # the pixel axis is exact (bias dropped in-kernel => padded pixels add 0 to
    # the stats sums and produce 0 in the gated output, which we slice off).
    x3 = x.reshape(N, Cin, HW)
    g3 = g.reshape(N, Cg, HW)
    if HWp != HW:
        x3 = jnp.pad(x3, ((0, 0), (0, 0), (0, HWp - HW)))
        g3 = jnp.pad(g3, ((0, 0), (0, 0), (0, HWp - HW)))

    wx = params["w_x"].astype(mxu_dt)                # (Ci, Cin) PyTorch conv layout
    wg = params["w_g"].astype(mxu_dt)                # (Ci, Cg)

    data_spec = lambda c: pl.BlockSpec((None, c, tile), lambda n, t: (n, 0, t))
    param_spec = lambda r, c: pl.BlockSpec((r, c), lambda n, t: (0, 0))
    stats_spec = pl.BlockSpec((None, Ci, 1), lambda n, t: (n, 0, 0))
    stats_shape = jax.ShapeDtypeStruct((N, Ci, 1), jnp.float32)

    # ---- pass 1: per-batch partial stats ("parallel" batch, "arbitrary" pixels)
    sx, sxx, sg, sgg = pl.pallas_call(
        _stats_kernel,
        grid=(N, T),
        in_specs=[data_spec(Cin), data_spec(Cg),
                  param_spec(Ci, Cin), param_spec(Ci, Cg)],
        out_specs=[stats_spec, stats_spec, stats_spec, stats_spec],
        out_shape=[stats_shape, stats_shape, stats_shape, stats_shape],
        compiler_params=pltpu.CompilerParams(
            dimension_semantics=("parallel", "arbitrary"),
            vmem_limit_bytes=vmem_budget),
    )(x3, g3, wx, wg)

    # ---- host-side fold: reduce over batch, BN -> scale/shift, fold scales
    # straight into the conv weights and merge the shifts into one bias.
    inv_p = 1.0 / float(P)

    def fold(s, ss, gamma, beta):
        s = jnp.sum(s, axis=0)                       # (Ci, 1)
        ss = jnp.sum(ss, axis=0)                     # (Ci, 1)
        mean = s * inv_p
        var = jnp.maximum(ss * inv_p - mean * mean, 0.0)
        scale = gamma.reshape(Ci, 1) / jnp.sqrt(var + BN_EPS)
        shift = beta.reshape(Ci, 1) - mean * scale
        return scale, shift

    sc_x, sh_x = fold(sx, sxx, params["gamma_x"], params["beta_x"])
    sc_g, sh_g = fold(sg, sgg, params["gamma_g"], params["beta_g"])

    wx_f = (sc_x * params["w_x"].astype(jnp.float32)).astype(mxu_dt)     # (Ci, Cin)
    wg_f = (sc_g * params["w_g"].astype(jnp.float32)).astype(mxu_dt)     # (Ci, Cg)
    bias = (sh_x + sh_g).astype(jnp.float32)                             # (Ci, 1)
    psi_w = params["psi_w"].reshape(Ci, 1).astype(jnp.float32)
    psi_b = params["psi_b"].reshape(1, 1).astype(jnp.float32)

    # ---- pass 2: fused conv+BN, ReLU, psi, sigmoid, gate (fully parallel grid)
    out3 = pl.pallas_call(
        _apply_kernel,
        grid=(N, T),
        in_specs=[data_spec(Cin), data_spec(Cg),
                  param_spec(Ci, Cin), param_spec(Ci, Cg),
                  param_spec(Ci, 1), param_spec(Ci, 1), param_spec(1, 1)],
        out_specs=data_spec(Cin),
        out_shape=jax.ShapeDtypeStruct((N, Cin, HWp), x.dtype),
        compiler_params=pltpu.CompilerParams(
            dimension_semantics=("parallel", "parallel"),
            vmem_limit_bytes=vmem_budget),
    )(x3, g3, wx_f, wg_f, bias, psi_w, psi_b)

    if HWp != HW:
        out3 = out3[:, :, :HW]
    return out3.reshape(N, Cin, H, W)


# --------------------------------------------------------------------------
# Parameters (PyTorch Conv2d weight layout (out, in); BN default init)
# --------------------------------------------------------------------------
def init_params(key, in_channels, gating_channels, inter_channels):
    ks = jax.random.split(key, 6)
    f32 = jnp.float32
    return {
        "w_g": 0.1 * jax.random.normal(ks[0], (inter_channels, gating_channels), f32),
        "b_g": 0.1 * jax.random.normal(ks[1], (inter_channels,), f32),
        "w_x": 0.1 * jax.random.normal(ks[2], (inter_channels, in_channels), f32),
        "b_x": 0.1 * jax.random.normal(ks[3], (inter_channels,), f32),
        "psi_w": 0.1 * jax.random.normal(ks[4], (1, inter_channels), f32),
        "psi_b": 0.1 * jax.random.normal(ks[5], (1,), f32),
        "gamma_g": jnp.ones((inter_channels,), f32),
        "beta_g": jnp.zeros((inter_channels,), f32),
        "gamma_x": jnp.ones((inter_channels,), f32),
        "beta_x": jnp.zeros((inter_channels,), f32),
    }


# --------------------------------------------------------------------------
# Pure-JAX reference (mirrors the PyTorch forward in training mode; conv
# biases included -- they cancel under BN, so results are identical).
# --------------------------------------------------------------------------
def attention_gate_ref(x, g, p):
    N, Cin, H, W = x.shape
    Cg = g.shape[1]
    xf = jnp.transpose(x, (0, 2, 3, 1)).reshape(-1, Cin).astype(jnp.float32)
    gf = jnp.transpose(g, (0, 2, 3, 1)).reshape(-1, Cg).astype(jnp.float32)
    x1 = xf @ p["w_x"].T + p["b_x"]
    g1 = gf @ p["w_g"].T + p["b_g"]

    def bn(y, gamma, beta):
        m = jnp.mean(y, axis=0, keepdims=True)
        v = jnp.mean((y - m) ** 2, axis=0, keepdims=True)
        return (y - m) / jnp.sqrt(v + BN_EPS) * gamma + beta

    add = jax.nn.relu(bn(g1, p["gamma_g"], p["beta_g"]) +
                      bn(x1, p["gamma_x"], p["beta_x"]))
    att = jax.nn.sigmoid(add @ p["psi_w"].T + p["psi_b"])
    out = xf * att
    return jnp.transpose(out.reshape(N, H, W, Cin), (0, 3, 1, 2))


if __name__ == "__main__":
    key = jax.random.PRNGKey(0)
    k_x, k_g, k_p = jax.random.split(key, 3)

    N, Cin, Cg, Ci = 2, 4, 8, 8
    params = init_params(k_p, Cin, Cg, Ci)
    gate = jax.jit(attention_gate)

    # 1) f32, 128-aligned pixel count (16*16 = 256): strict check.
    x = jax.random.normal(k_x, (N, Cin, 16, 16), jnp.float32)
    g = jax.random.normal(k_g, (N, Cg, 16, 16), jnp.float32)
    out = jax.block_until_ready(gate(x, g, params))
    ref = jax.block_until_ready(attention_gate_ref(x, g, params))
    assert out.shape == (N, Cin, 16, 16)
    np.testing.assert_allclose(np.asarray(out), np.asarray(ref), rtol=1e-4, atol=1e-4)

    # 2) f32, H*W not a multiple of 128 (12*12 = 144): exercises the padded path,
    #    still exact (padding contributes zero to the BN statistics).
    x2 = jax.random.normal(k_x, (N, Cin, 12, 12), jnp.float32)
    g2 = jax.random.normal(k_g, (N, Cg, 12, 12), jnp.float32)
    out2 = jax.block_until_ready(gate(x2, g2, params))
    ref2 = attention_gate_ref(x2, g2, params)
    np.testing.assert_allclose(np.asarray(out2), np.asarray(ref2), rtol=1e-4, atol=1e-4)

    # 3) bf16 inputs: native bf16 MXU path (loose tolerance by construction).
    xb = x.astype(jnp.bfloat16)
    gb = g.astype(jnp.bfloat16)
    outb = jax.block_until_ready(gate(xb, gb, params))
    refb = attention_gate_ref(xb, gb, params)
    np.testing.assert_allclose(np.asarray(outb, dtype=np.float32), np.asarray(refb),
                               rtol=1e-1, atol=1e-1)

    print("KERNEL_OK")
</pallas_src>

<mosaic_0001>
module attributes {stable_mosaic.version = 11 : i64} {
  func.func @_stats_kernel(%arg0: i32, %arg1: i32, %arg2: memref<1x4x256xf32, #tpu.memory_space<vmem>>, %arg3: memref<1x8x256xf32, #tpu.memory_space<vmem>>, %arg4: memref<8x4xf32, #tpu.memory_space<vmem>>, %arg5: memref<8x8xf32, #tpu.memory_space<vmem>>, %arg6: memref<1x8x1xf32, #tpu.memory_space<vmem>>, %arg7: memref<1x8x1xf32, #tpu.memory_space<vmem>>, %arg8: memref<1x8x1xf32, #tpu.memory_space<vmem>>, %arg9: memref<1x8x1xf32, #tpu.memory_space<vmem>>) attributes {dimension_semantics = [#tpu.dimension_semantics<parallel>, #tpu.dimension_semantics<arbitrary>], iteration_bounds = array<i64: 2, 1>, scalar_prefetch = 0 : i64, scratch_operands = 0 : i64, tpu.core_type = #tpu.core_type<tc>, window_params = [{transform_indices = @transform_0, window_bounds = array<i64: 1, 4, 256>}, {transform_indices = @transform_1, window_bounds = array<i64: 1, 8, 256>}, {pipeline_mode = #tpu.pipeline_mode<synchronous>, transform_indices = @transform_2, window_bounds = array<i64: 8, 4>}, {pipeline_mode = #tpu.pipeline_mode<synchronous>, transform_indices = @transform_3, window_bounds = array<i64: 8, 8>}, {transform_indices = @transform_4, window_bounds = array<i64: 1, 8, 1>}, {transform_indices = @transform_5, window_bounds = array<i64: 1, 8, 1>}, {transform_indices = @transform_6, window_bounds = array<i64: 1, 8, 1>}, {transform_indices = @transform_7, window_bounds = array<i64: 1, 8, 1>}]} {
    %c0_i32 = arith.constant 0 : i32
    %0 = arith.cmpi eq, %arg1, %c0_i32 : i32
    %1 = arith.extui %0 : i1 to i32
    %c0_i32_0 = arith.constant 0 : i32
    %2 = arith.cmpi ne, %1, %c0_i32_0 : i32
    scf.if %2 {
      %cst_39 = arith.constant 0.000000e+00 : f32
      %45 = vector.broadcast %cst_39 : f32 to vector<8x1xf32>
      %c0_40 = arith.constant 0 : index
      %c0_41 = arith.constant 0 : index
      %c0_42 = arith.constant 0 : index
      %46 = vector.load %arg6[%c0_40, %c0_41, %c0_42] : memref<1x8x1xf32, #tpu.memory_space<vmem>>, vector<1x8x1xf32>
      %47 = vector.shape_cast %46 : vector<1x8x1xf32> to vector<8x1xf32>
      %48 = vector.shape_cast %45 : vector<8x1xf32> to vector<1x8x1xf32>
      tpu.vector_store %arg6[%c0_40, %c0_41, %c0_42], %48 {strides = array<i32>} : memref<1x8x1xf32, #tpu.memory_space<vmem>>, vector<1x8x1xf32>,
      %cst_43 = arith.constant 0.000000e+00 : f32
      %49 = vector.broadcast %cst_43 : f32 to vector<8x1xf32>
      %c0_44 = arith.constant 0 : index
      %c0_45 = arith.constant 0 : index
      %c0_46 = arith.constant 0 : index
      %50 = vector.load %arg7[%c0_44, %c0_45, %c0_46] : memref<1x8x1xf32, #tpu.memory_space<vmem>>, vector<1x8x1xf32>
      %51 = vector.shape_cast %50 : vector<1x8x1xf32> to vector<8x1xf32>
      %52 = vector.shape_cast %49 : vector<8x1xf32> to vector<1x8x1xf32>
      tpu.vector_store %arg7[%c0_44, %c0_45, %c0_46], %52 {strides = array<i32>} : memref<1x8x1xf32, #tpu.memory_space<vmem>>, vector<1x8x1xf32>,
      %cst_47 = arith.constant 0.000000e+00 : f32
      %53 = vector.broadcast %cst_47 : f32 to vector<8x1xf32>
      %c0_48 = arith.constant 0 : index
      %c0_49 = arith.constant 0 : index
      %c0_50 = arith.constant 0 : index
      %54 = vector.load %arg8[%c0_48, %c0_49, %c0_50] : memref<1x8x1xf32, #tpu.memory_space<vmem>>, vector<1x8x1xf32>
      %55 = vector.shape_cast %54 : vector<1x8x1xf32> to vector<8x1xf32>
      %56 = vector.shape_cast %53 : vector<8x1xf32> to vector<1x8x1xf32>
      tpu.vector_store %arg8[%c0_48, %c0_49, %c0_50], %56 {strides = array<i32>} : memref<1x8x1xf32, #tpu.memory_space<vmem>>, vector<1x8x1xf32>,
      %cst_51 = arith.constant 0.000000e+00 : f32
      %57 = vector.broadcast %cst_51 : f32 to vector<8x1xf32>
      %c0_52 = arith.constant 0 : index
      %c0_53 = arith.constant 0 : index
      %c0_54 = arith.constant 0 : index
      %58 = vector.load %arg9[%c0_52, %c0_53, %c0_54] : memref<1x8x1xf32, #tpu.memory_space<vmem>>, vector<1x8x1xf32>
      %59 = vector.shape_cast %58 : vector<1x8x1xf32> to vector<8x1xf32>
      %60 = vector.shape_cast %57 : vector<8x1xf32> to vector<1x8x1xf32>
      tpu.vector_store %arg9[%c0_52, %c0_53, %c0_54], %60 {strides = array<i32>} : memref<1x8x1xf32, #tpu.memory_space<vmem>>, vector<1x8x1xf32>,
    } else {
    }
    %c0 = arith.constant 0 : index
    %c0_1 = arith.constant 0 : index
    %c0_2 = arith.constant 0 : index
    %3 = vector.load %arg2[%c0, %c0_1, %c0_2] : memref<1x4x256xf32, #tpu.memory_space<vmem>>, vector<1x4x256xf32>
    %4 = vector.shape_cast %3 : vector<1x4x256xf32> to vector<4x256xf32>
    %c0_3 = arith.constant 0 : index
    %c0_4 = arith.constant 0 : index
    %c0_5 = arith.constant 0 : index
    %5 = vector.load %arg3[%c0_3, %c0_4, %c0_5] : memref<1x8x256xf32, #tpu.memory_space<vmem>>, vector<1x8x256xf32>
    %6 = vector.shape_cast %5 : vector<1x8x256xf32> to vector<8x256xf32>
    %c0_6 = arith.constant 0 : index
    %c0_7 = arith.constant 0 : index
    %7 = vector.load %arg4[%c0_6, %c0_7] : memref<8x4xf32, #tpu.memory_space<vmem>>, vector<8x4xf32>
    %cst = arith.constant dense<0.000000e+00> : vector<8x256xf32>
    %8 = tpu.matmul %7, %4, %cst {dimension_numbers = #tpu.dot_dimension_numbers<[1], [0], [0], [1], [0, 0, 1, 1], [], []>} : vector<8x4xf32>, vector<4x256xf32>, vector<8x256xf32> -> vector<8x256xf32>
    %c0_8 = arith.constant 0 : index
    %c0_9 = arith.constant 0 : index
    %9 = vector.load %arg5[%c0_8, %c0_9] : memref<8x8xf32, #tpu.memory_space<vmem>>, vector<8x8xf32>
    %cst_10 = arith.constant dense<0.000000e+00> : vector<8x256xf32>
    %10 = tpu.matmul %9, %6, %cst_10 {dimension_numbers = #tpu.dot_dimension_numbers<[1], [0], [0], [1], [0, 0, 1, 1], [], []>} : vector<8x8xf32>, vector<8x256xf32>, vector<8x256xf32> -> vector<8x256xf32>
    %c0_11 = arith.constant 0 : index
    %c0_12 = arith.constant 0 : index
    %c0_13 = arith.constant 0 : index
    %11 = vector.load %arg6[%c0_11, %c0_12, %c0_13] : memref<1x8x1xf32, #tpu.memory_space<vmem>>, vector<1x8x1xf32>
    %12 = vector.shape_cast %11 : vector<1x8x1xf32> to vector<8x1xf32>
    %cst_14 = arith.constant dense<0.000000e+00> : vector<8xf32>
    %13 = vector.multi_reduction <add>, %8, %cst_14 [1] : vector<8x256xf32> to vector<8xf32>
    %14 = vector.shape_cast %13 : vector<8xf32> to vector<8x1xf32>
    %15 = arith.addf %12, %14 : vector<8x1xf32>
    %c0_15 = arith.constant 0 : index
    %c0_16 = arith.constant 0 : index
    %c0_17 = arith.constant 0 : index
    %16 = vector.load %arg6[%c0_15, %c0_16, %c0_17] : memref<1x8x1xf32, #tpu.memory_space<vmem>>, vector<1x8x1xf32>
    %17 = vector.shape_cast %16 : vector<1x8x1xf32> to vector<8x1xf32>
    %18 = vector.shape_cast %15 : vector<8x1xf32> to vector<1x8x1xf32>
    tpu.vector_store %arg6[%c0_15, %c0_16, %c0_17], %18 {strides = array<i32>} : memref<1x8x1xf32, #tpu.memory_space<vmem>>, vector<1x8x1xf32>,
    %c0_18 = arith.constant 0 : index
    %c0_19 = arith.constant 0 : index
    %c0_20 = arith.constant 0 : index
    %19 = vector.load %arg7[%c0_18, %c0_19, %c0_20] : memref<1x8x1xf32, #tpu.memory_space<vmem>>, vector<1x8x1xf32>
    %20 = vector.shape_cast %19 : vector<1x8x1xf32> to vector<8x1xf32>
    %21 = arith.mulf %8, %8 : vector<8x256xf32>
    %cst_21 = arith.constant dense<0.000000e+00> : vector<8xf32>
    %22 = vector.multi_reduction <add>, %21, %cst_21 [1] : vector<8x256xf32> to vector<8xf32>
    %23 = vector.shape_cast %22 : vector<8xf32> to vector<8x1xf32>
    %24 = arith.addf %20, %23 : vector<8x1xf32>
    %c0_22 = arith.constant 0 : index
    %c0_23 = arith.constant 0 : index
    %c0_24 = arith.constant 0 : index
    %25 = vector.load %arg7[%c0_22, %c0_23, %c0_24] : memref<1x8x1xf32, #tpu.memory_space<vmem>>, vector<1x8x1xf32>
    %26 = vector.shape_cast %25 : vector<1x8x1xf32> to vector<8x1xf32>
    %27 = vector.shape_cast %24 : vector<8x1xf32> to vector<1x8x1xf32>
    tpu.vector_store %arg7[%c0_22, %c0_23, %c0_24], %27 {strides = array<i32>} : memref<1x8x1xf32, #tpu.memory_space<vmem>>, vector<1x8x1xf32>,
    %c0_25 = arith.constant 0 : index
    %c0_26 = arith.constant 0 : index
    %c0_27 = arith.constant 0 : index
    %28 = vector.load %arg8[%c0_25, %c0_26, %c0_27] : memref<1x8x1xf32, #tpu.memory_space<vmem>>, vector<1x8x1xf32>
    %29 = vector.shape_cast %28 : vector<1x8x1xf32> to vector<8x1xf32>
    %cst_28 = arith.constant dense<0.000000e+00> : vector<8xf32>
    %30 = vector.multi_reduction <add>, %10, %cst_28 [1] : vector<8x256xf32> to vector<8xf32>
    %31 = vector.shape_cast %30 : vector<8xf32> to vector<8x1xf32>
    %32 = arith.addf %29, %31 : vector<8x1xf32>
    %c0_29 = arith.constant 0 : index
    %c0_30 = arith.constant 0 : index
    %c0_31 = arith.constant 0 : index
    %33 = vector.load %arg8[%c0_29, %c0_30, %c0_31] : memref<1x8x1xf32, #tpu.memory_space<vmem>>, vector<1x8x1xf32>
    %34 = vector.shape_cast %33 : vector<1x8x1xf32> to vector<8x1xf32>
    %35 = vector.shape_cast %32 : vector<8x1xf32> to vector<1x8x1xf32>
    tpu.vector_store %arg8[%c0_29, %c0_30, %c0_31], %35 {strides = array<i32>} : memref<1x8x1xf32, #tpu.memory_space<vmem>>, vector<1x8x1xf32>,
    %c0_32 = arith.constant 0 : index
    %c0_33 = arith.constant 0 : index
    %c0_34 = arith.constant 0 : index
    %36 = vector.load %arg9[%c0_32, %c0_33, %c0_34] : memref<1x8x1xf32, #tpu.memory_space<vmem>>, vector<1x8x1xf32>
    %37 = vector.shape_cast %36 : vector<1x8x1xf32> to vector<8x1xf32>
    %38 = arith.mulf %10, %10 : vector<8x256xf32>
    %cst_35 = arith.constant dense<0.000000e+00> : vector<8xf32>
    %39 = vector.multi_reduction <add>, %38, %cst_35 [1] : vector<8x256xf32> to vector<8xf32>
    %40 = vector.shape_cast %39 : vector<8xf32> to vector<8x1xf32>
    %41 = arith.addf %37, %40 : vector<8x1xf32>
    %c0_36 = arith.constant 0 : index
    %c0_37 = arith.constant 0 : index
    %c0_38 = arith.constant 0 : index
    %42 = vector.load %arg9[%c0_36, %c0_37, %c0_38] : memref<1x8x1xf32, #tpu.memory_space<vmem>>, vector<1x8x1xf32>
    %43 = vector.shape_cast %42 : vector<1x8x1xf32> to vector<8x1xf32>
    %44 = vector.shape_cast %41 : vector<8x1xf32> to vector<1x8x1xf32>
    tpu.vector_store %arg9[%c0_36, %c0_37, %c0_38], %44 {strides = array<i32>} : memref<1x8x1xf32, #tpu.memory_space<vmem>>, vector<1x8x1xf32>,
    return
  }
  func.func @transform_0(%arg0: i32, %arg1: i32) -> (i32, i32, i32) {
    %c0_i32 = arith.constant 0 : i32
    %c0_i32_0 = arith.constant 0 : i32
    return %arg0, %c0_i32, %arg1 : i32, i32, i32
  }
  func.func @transform_1(%arg0: i32, %arg1: i32) -> (i32, i32, i32) {
    %c0_i32 = arith.constant 0 : i32
    %c0_i32_0 = arith.constant 0 : i32
    return %arg0, %c0_i32, %arg1 : i32, i32, i32
  }
  func.func @transform_2(%arg0: i32, %arg1: i32) -> (i32, i32) {
    %c0_i32 = arith.constant 0 : i32
    %c0_i32_0 = arith.constant 0 : i32
    %c0_i32_1 = arith.constant 0 : i32
    return %c0_i32, %c0_i32_0 : i32, i32
  }
  func.func @transform_3(%arg0: i32, %arg1: i32) -> (i32, i32) {
    %c0_i32 = arith.constant 0 : i32
    %c0_i32_0 = arith.constant 0 : i32
    %c0_i32_1 = arith.constant 0 : i32
    return %c0_i32, %c0_i32_0 : i32, i32
  }
  func.func @transform_4(%arg0: i32, %arg1: i32) -> (i32, i32, i32) {
    %c0_i32 = arith.constant 0 : i32
    %c0_i32_0 = arith.constant 0 : i32
    %c0_i32_1 = arith.constant 0 : i32
    return %arg0, %c0_i32, %c0_i32_0 : i32, i32, i32
  }
  func.func @transform_5(%arg0: i32, %arg1: i32) -> (i32, i32, i32) {
    %c0_i32 = arith.constant 0 : i32
    %c0_i32_0 = arith.constant 0 : i32
    %c0_i32_1 = arith.constant 0 : i32
    return %arg0, %c0_i32, %c0_i32_0 : i32, i32, i32
  }
  func.func @transform_6(%arg0: i32, %arg1: i32) -> (i32, i32, i32) {
    %c0_i32 = arith.constant 0 : i32
    %c0_i32_0 = arith.constant 0 : i32
    %c0_i32_1 = arith.constant 0 : i32
    return %arg0, %c0_i32, %c0_i32_0 : i32, i32, i32
  }
  func.func @transform_7(%arg0: i32, %arg1: i32) -> (i32, i32, i32) {
    %c0_i32 = arith.constant 0 : i32
    %c0_i32_0 = arith.constant 0 : i32
    %c0_i32_1 = arith.constant 0 : i32
    return %arg0, %c0_i32, %c0_i32_0 : i32, i32, i32
  }
}

module attributes {stable_mosaic.version = 11 : i64} {
  func.func @_apply_kernel(%arg0: i32, %arg1: i32, %arg2: memref<1x4x256xf32, #tpu.memory_space<vmem>>, %arg3: memref<1x8x256xf32, #tpu.memory_space<vmem>>, %arg4: memref<8x4xf32, #tpu.memory_space<vmem>>, %arg5: memref<8x8xf32, #tpu.memory_space<vmem>>, %arg6: memref<8x1xf32, #tpu.memory_space<vmem>>, %arg7: memref<8x1xf32, #tpu.memory_space<vmem>>, %arg8: memref<1x1xf32, #tpu.memory_space<vmem>>, %arg9: memref<1x4x256xf32, #tpu.memory_space<vmem>>) attributes {dimension_semantics = [#tpu.dimension_semantics<parallel>, #tpu.dimension_semantics<parallel>], iteration_bounds = array<i64: 2, 1>, scalar_prefetch = 0 : i64, scratch_operands = 0 : i64, tpu.core_type = #tpu.core_type<tc>, window_params = [{transform_indices = @transform_0, window_bounds = array<i64: 1, 4, 256>}, {transform_indices = @transform_1, window_bounds = array<i64: 1, 8, 256>}, {pipeline_mode = #tpu.pipeline_mode<synchronous>, transform_indices = @transform_2, window_bounds = array<i64: 8, 4>}, {pipeline_mode = #tpu.pipeline_mode<synchronous>, transform_indices = @transform_3, window_bounds = array<i64: 8, 8>}, {pipeline_mode = #tpu.pipeline_mode<synchronous>, transform_indices = @transform_4, window_bounds = array<i64: 8, 1>}, {pipeline_mode = #tpu.pipeline_mode<synchronous>, transform_indices = @transform_5, window_bounds = array<i64: 8, 1>}, {pipeline_mode = #tpu.pipeline_mode<synchronous>, transform_indices = @transform_6, window_bounds = array<i64: 1, 1>}, {transform_indices = @transform_7, window_bounds = array<i64: 1, 4, 256>}]} {
    %c0 = arith.constant 0 : index
    %c0_0 = arith.constant 0 : index
    %c0_1 = arith.constant 0 : index
    %0 = vector.load %arg2[%c0, %c0_0, %c0_1] : memref<1x4x256xf32, #tpu.memory_space<vmem>>, vector<1x4x256xf32>
    %1 = vector.shape_cast %0 : vector<1x4x256xf32> to vector<4x256xf32>
    %c0_2 = arith.constant 0 : index
    %c0_3 = arith.constant 0 : index
    %c0_4 = arith.constant 0 : index
    %2 = vector.load %arg3[%c0_2, %c0_3, %c0_4] : memref<1x8x256xf32, #tpu.memory_space<vmem>>, vector<1x8x256xf32>
    %3 = vector.shape_cast %2 : vector<1x8x256xf32> to vector<8x256xf32>
    %c0_5 = arith.constant 0 : index
    %c0_6 = arith.constant 0 : index
    %4 = vector.load %arg4[%c0_5, %c0_6] : memref<8x4xf32, #tpu.memory_space<vmem>>, vector<8x4xf32>
    %cst = arith.constant dense<0.000000e+00> : vector<8x256xf32>
    %5 = tpu.matmul %4, %1, %cst {dimension_numbers = #tpu.dot_dimension_numbers<[1], [0], [0], [1], [0, 0, 1, 1], [], []>} : vector<8x4xf32>, vector<4x256xf32>, vector<8x256xf32> -> vector<8x256xf32>
    %c0_7 = arith.constant 0 : index
    %c0_8 = arith.constant 0 : index
    %6 = vector.load %arg5[%c0_7, %c0_8] : memref<8x8xf32, #tpu.memory_space<vmem>>, vector<8x8xf32>
    %cst_9 = arith.constant dense<0.000000e+00> : vector<8x256xf32>
    %7 = tpu.matmul %6, %3, %cst_9 {dimension_numbers = #tpu.dot_dimension_numbers<[1], [0], [0], [1], [0, 0, 1, 1], [], []>} : vector<8x8xf32>, vector<8x256xf32>, vector<8x256xf32> -> vector<8x256xf32>
    %8 = arith.addf %5, %7 : vector<8x256xf32>
    %c0_10 = arith.constant 0 : index
    %c0_11 = arith.constant 0 : index
    %9 = vector.load %arg6[%c0_10, %c0_11] : memref<8x1xf32, #tpu.memory_space<vmem>>, vector<8x1xf32>
    %10 = vector.broadcast %9 : vector<8x1xf32> to vector<8x256xf32>
    %11 = arith.addf %8, %10 : vector<8x256xf32>
    %cst_12 = arith.constant 0.000000e+00 : f32
    %12 = vector.broadcast %cst_12 : f32 to vector<8x256xf32>
    %13 = arith.maximumf %11, %12 : vector<8x256xf32>
    %c0_13 = arith.constant 0 : index
    %c0_14 = arith.constant 0 : index
    %14 = vector.load %arg7[%c0_13, %c0_14] : memref<8x1xf32, #tpu.memory_space<vmem>>, vector<8x1xf32>
    %15 = vector.broadcast %14 : vector<8x1xf32> to vector<8x256xf32>
    %16 = arith.mulf %13, %15 : vector<8x256xf32>
    %cst_15 = arith.constant dense<0.000000e+00> : vector<256xf32>
    %17 = vector.multi_reduction <add>, %16, %cst_15 [0] : vector<8x256xf32> to vector<256xf32>
    %18 = vector.shape_cast %17 : vector<256xf32> to vector<1x256xf32>
    %c0_16 = arith.constant 0 : index
    %c0_17 = arith.constant 0 : index
    %19 = vector.load %arg8[%c0_16, %c0_17] : memref<1x1xf32, #tpu.memory_space<vmem>>, vector<1x1xf32>
    %20 = vector.broadcast %19 : vector<1x1xf32> to vector<1x256xf32>
    %21 = arith.addf %18, %20 : vector<1x256xf32>
    %22 = arith.negf %21 : vector<1x256xf32>
    %23 = math.exp %22 : vector<1x256xf32>
    %cst_18 = arith.constant 1.000000e+00 : f32
    %24 = vector.broadcast %cst_18 : f32 to vector<1x256xf32>
    %25 = arith.addf %24, %23 : vector<1x256xf32>
    %26 = arith.divf %24, %25 : vector<1x256xf32>
    %27 = vector.broadcast %26 : vector<1x256xf32> to vector<4x256xf32>
    %28 = arith.mulf %1, %27 : vector<4x256xf32>
    %c0_19 = arith.constant 0 : index
    %c0_20 = arith.constant 0 : index
    %c0_21 = arith.constant 0 : index
    %29 = vector.load %arg9[%c0_19, %c0_20, %c0_21] : memref<1x4x256xf32, #tpu.memory_space<vmem>>, vector<1x4x256xf32>
    %30 = vector.shape_cast %29 : vector<1x4x256xf32> to vector<4x256xf32>
    %31 = vector.shape_cast %28 : vector<4x256xf32> to vector<1x4x256xf32>
    tpu.vector_store %arg9[%c0_19, %c0_20, %c0_21], %31 {strides = array<i32>} : memref<1x4x256xf32, #tpu.memory_space<vmem>>, vector<1x4x256xf32>,
    return
  }
  func.func @transform_0(%arg0: i32, %arg1: i32) -> (i32, i32, i32) {
    %c0_i32 = arith.constant 0 : i32
    %c0_i32_0 = arith.constant 0 : i32
    return %arg0, %c0_i32, %arg1 : i32, i32, i32
  }
  func.func @transform_1(%arg0: i32, %arg1: i32) -> (i32, i32, i32) {
    %c0_i32 = arith.constant 0 : i32
    %c0_i32_0 = arith.constant 0 : i32
    return %arg0, %c0_i32, %arg1 : i32, i32, i32
  }
  func.func @transform_2(%arg0: i32, %arg1: i32) -> (i32, i32) {
    %c0_i32 = arith.constant 0 : i32
    %c0_i32_0 = arith.constant 0 : i32
    %c0_i32_1 = arith.constant 0 : i32
    return %c0_i32, %c0_i32_0 : i32, i32
  }
  func.func @transform_3(%arg0: i32, %arg1: i32) -> (i32, i32) {
    %c0_i32 = arith.constant 0 : i32
    %c0_i32_0 = arith.constant 0 : i32
    %c0_i32_1 = arith.constant 0 : i32
    return %c0_i32, %c0_i32_0 : i32, i32
  }
  func.func @transform_4(%arg0: i32, %arg1: i32) -> (i32, i32) {
    %c0_i32 = arith.constant 0 : i32
    %c0_i32_0 = arith.constant 0 : i32
    %c0_i32_1 = arith.constant 0 : i32
    return %c0_i32, %c0_i32_0 : i32, i32
  }
  func.func @transform_5(%arg0: i32, %arg1: i32) -> (i32, i32) {
    %c0_i32 = arith.constant 0 : i32
    %c0_i32_0 = arith.constant 0 : i32
    %c0_i32_1 = arith.constant 0 : i32
    return %c0_i32, %c0_i32_0 : i32, i32
  }
  func.func @transform_6(%arg0: i32, %arg1: i32) -> (i32, i32) {
    %c0_i32 = arith.constant 0 : i32
    %c0_i32_0 = arith.constant 0 : i32
    %c0_i32_1 = arith.constant 0 : i32
    return %c0_i32, %c0_i32_0 : i32, i32
  }
  func.func @transform_7(%arg0: i32, %arg1: i32) -> (i32, i32, i32) {
    %c0_i32 = arith.constant 0 : i32
    %c0_i32_0 = arith.constant 0 : i32
    return %arg0, %c0_i32, %arg1 : i32, i32, i32
  }
}

</mosaic_0001>

<bundles_post_ra>
// kernel: attention_gate.2
= control target key start
LH: loop header
LB: loop body
LE: loop exit
PB: predicated region body
PF: predicated region fallthrough
CT: control target
= control target key end

     0   :  { %s862_s24 = smov 0   ;;  %s864_s25 = smov 0   ;;  %s928_s0 = inlined_call_operand.vmem [shape: f32[2,4,256], index: 0, kind: input, shape index: {}]   ;;  %s929_s1 = inlined_call_operand.vmem [shape: f32[2,8,256], index: 1, kind: input, shape index: {}]   ;;  %s930_s2 = inlined_call_operand.vmem [shape: f32[8,4], index: 2, kind: input, shape index: {}]   ;;  %s931_s3 = inlined_call_operand.vmem [shape: f32[8,8], index: 3, kind: input, shape index: {}]   ;;  %s932_s4 = inlined_call_operand.vmem [shape: f32[2,8,1], index: 4, kind: output, shape index: {0}]   ;;  %s933_s5 = inlined_call_operand.vmem [shape: f32[2,8,1], index: 5, kind: output, shape index: {1}]   ;;  %s934_s6 = inlined_call_operand.vmem [shape: f32[2,8,1], index: 6, kind: output, shape index: {2}]   ;;  %s935_s7 = inlined_call_operand.vmem [shape: f32[2,8,1], index: 7, kind: output, shape index: {3}]  }
   0x1   :  { %s866_s26 = smov 0  }
   0x2 LB: > { %s30_s27 = sadd.s32 1, %s815_s25  ;;  %p754_p0 = scmp.ge.s32.totalorder %s819_s26, 1  ;;  %s819_s26 = sphi %s866_s26, %s18_s26   ;;  %s815_s25 = sphi %s864_s25, %s937_s25   ;;  %s811_s24 = sphi %s862_s24, %s936_s24  }
   0x3   : > { %p32_p1 = scmp.ge.s32.totalorder %s30_s27, 2  ;;  %p280_p2 = scmp.lt.s32.totalorder %s819_s26, 3 }
   0x5   : > { %s939_s27 = smov (%p32_p1, %s30_s27), 0  ;;  %p281_p3 = pnand %p754_p0, %p280_p2 }
   0x6   : > { %p337_p4 = scmp.lt.s32.totalorder (!%p281_p3), %s811_s24, 1  ;;  %v821_v0 = vmov (!%p281_p3), 0.0   ;;  %v467_v1 = vld [vmem:[%s931_s3] sm:$0xff] (!%p281_p3)  ;;  %vm391_vm0 = vcmask (!%p281_p3), 1043456   ;;  %vm468_vm1 = vcmask (!%p281_p3), 64512   ;;  %vm387_vm2 = vcmask (!%p281_p3), 31744  }
   0x7   : > { %284 = sbr.rel (%p281_p3) target bundleno = 387 (0x183), region = 36  ;;  %536 = vmatprep.mubr.f32.mxu1 (!%p281_p3), %v821_v0  ;;  %460 = vmatprep.mubr.f32.mxu0 (!%p281_p3), %v821_v0  ;;  %v384_v6 = vld [vmem:[%s930_s2] sm:$0xff] (!%p281_p3)  ;;  %vm376_vm3 = vcmask (!%p281_p3), 7168  }
   0xe   : > { %s941_s24 = smov (!%p337_p4, %s811_s24), 1 }
   0xf   : > { %s880_s28 = sshll.u32 %s941_s24, 3  ;;  %s770_s29 = sshll.u32 %s941_s24, 4 }
  0x10   : > { %s354_s9 = scalar_lea.vmem %s929_s1, %s770_s29  ;;  %s344_s12 = scalar_lea.vmem %s928_s0, %s880_s28 }
  0x11   : > { %v383_v2 = vld [vmem:[%s354_s9 + $0x8] sm:$0xff]  ;;  %v382_v3 = vld [vmem:[%s354_s9] sm:$0xff]  ;;  %s367_s19 = scalar_lea.vmem %s934_s6, %s880_s28  ;;  %s359_s22 = scalar_lea.vmem %s932_s4, %s880_s28 }
  0x12   : > { %v381_v4 = vld [vmem:[%s344_s12] sm:$0xff]  ;;  %472 = vmatprep.subr.mxu1 %v383_v2  ;;  %379 = vst.msk [vmem:[%s367_s19] sm:$0xff] %vm376_vm3, %v821_v0  ;;  %377 = vst.msk [vmem:[%s359_s22] sm:$0xff] %vm376_vm3, %v821_v0  ;;  %s371_s29 = scalar_lea.vmem %s935_s7, %s880_s28  ;;  %s363_s9 = scalar_lea.vmem %s933_s5, %s880_s28 }
  0x13   : > { %v386_v5 = vcombine.high %v381_v4, %v381_v4  ;;  %473 = vmatpush1.msra.mxu1 %v382_v3  ;;  %380 = vst.msk [vmem:[%s371_s29] sm:$0xff] %vm376_vm3, %v821_v0  ;;  %378 = vst.msk [vmem:[%s363_s9] sm:$0xff] %vm376_vm3, %v821_v0 }
  0x14   : > { %766 = vmatmul.mubr.msk.f32.vlgmr.msra.gmra.mrb[0].mxu1 %vm468_vm1, %v467_v1 }
  0x15   : > { %763 = vmatprep.subr.msk.mxu0 %vm391_vm0, %v386_v5 }
  0x16   : > { %764 = vmatpush1.msk.msra.mxu0 %vm391_vm0, %v381_v4 }
  0x17   : > { %765 = vmatmul.mubr.msk.f32.vlgmr.msra.gmra.mrb[0].mxu0 %vm387_vm2, %v384_v6 }
  0x19   : > { %v558_v19 = vld [vmem:[%s367_s19] sm:$0xff] }
  0x1a   : > { %v543_v21 = vld [vmem:[%s359_s22] sm:$0xff] }
  0x1b   : > { %v564_v24 = vld [vmem:[%s371_s29] sm:$0xff] }
  0x1c   : > { %v550_v27 = vld [vmem:[%s363_s9] sm:$0xff] }
  0xe7   : > { %v538_v7 = vpop.f32.mrb[0].mxu1 }
  0xe8   : > { %v565_v8 = vmul.f32 %v538_v7, %v538_v7  ;;  %v540_v9 = vpop.f32.mrb[1].mxu1 }
  0xe9   : > { %v566_v10 = vmul.f32 %v540_v9, %v540_v9  ;;  %v559_v12 = vadd.f32 %v540_v9, %v538_v7 }
  0xea   : > { %v462_v11 = vpop.f32.mrb[0].mxu0 }
  0xeb   : > { %v551_v13 = vmul.f32 %v462_v11, %v462_v11  ;;  %v464_v14 = vpop.f32.mrb[1].mxu0  ;;  %560 = vadd.xlane.f32.xlu1 %v559_v12  ;;  %v567_v17 = vadd.f32 %v566_v10, %v565_v8 }
  0xec   : > { %v552_v15 = vmul.f32 %v464_v14, %v464_v14  ;;  %v544_v16 = vadd.f32 %v464_v14, %v462_v11 }
  0xee   : > { %545 = vadd.xlane.f32.xlu0 %v544_v16  ;;  %v553_v18 = vadd.f32 %v552_v15, %v551_v13 }
  0xef   : > { %568 = vadd.xlane.f32.xlu1 %v567_v17 }
  0xf2   : > { %554 = vadd.xlane.f32.xlu0 %v553_v18 }
 0x178   : > { %v561_v20 = vpop.xlane.xlu1 %560 }
 0x179   : > { %v562_v22 = vadd.f32 %v561_v20, %v558_v19 }
 0x17b   : > { %v546_v23 = vpop.xlane.xlu0 %545  ;;  %563 = vst.msk [vmem:[%s367_s19] sm:$0xff] %vm376_vm3, %v562_v22 }
 0x17c   : > { %v547_v25 = vadd.f32 %v546_v23, %v543_v21  ;;  %v569_v26 = vpop.xlane.xlu1 %568 }
 0x17d   : > { %v570_v28 = vadd.f32 %v569_v26, %v564_v24 }
 0x17e   : > { %549 = vst.msk [vmem:[%s359_s22] sm:$0xff] %vm376_vm3, %v547_v25 }
 0x17f   : > { %v555_v29 = vpop.xlane.xlu0 %554  ;;  %571 = vst.msk [vmem:[%s371_s29] sm:$0xff] %vm376_vm3, %v570_v28 }
 0x180   : > { %v556_v30 = vadd.f32 %v555_v29, %v550_v27 }
 0x182   : > { %557 = vst.msk [vmem:[%s363_s9] sm:$0xff] %vm376_vm3, %v556_v30 }
 0x183 PF: > { %s18_s26 = sadd.s32 1, %s819_s26   ;;  %s936_s24 = smov %s815_s25 }
 0x184   : > { %p15_p5 = scmp.ge.s32.totalorder %s18_s26, 4   ;;  %s937_s25 = smov %s939_s27 }
 0x186   :  { %17 = sbr.rel (!%p15_p5) target bundleno = 2 (0x2), region = 109 }

// kernel: attention_gate.3
= control target key start
LH: loop header
LB: loop body
LE: loop exit
PB: predicated region body
PF: predicated region fallthrough
CT: control target
= control target key end

     0   :  { %s813_s26 = smov 0   ;;  %s815_s27 = smov 0   ;;  %s869_s0 = inlined_call_operand.vmem [shape: f32[2,4,256], index: 0, kind: input, shape index: {}]   ;;  %s870_s1 = inlined_call_operand.vmem [shape: f32[2,8,256], index: 1, kind: input, shape index: {}]   ;;  %s871_s2 = inlined_call_operand.vmem [shape: f32[8,4], index: 2, kind: input, shape index: {}]   ;;  %s872_s3 = inlined_call_operand.vmem [shape: f32[8,8], index: 3, kind: input, shape index: {}]   ;;  %s873_s4 = inlined_call_operand.vmem [shape: f32[8,1], index: 4, kind: input, shape index: {}]   ;;  %s874_s5 = inlined_call_operand.vmem [shape: f32[8,1], index: 5, kind: input, shape index: {}]   ;;  %s875_s6 = inlined_call_operand.<no memory space> [shape: f32[1,1], index: 6, kind: input, shape index: {}]   ;;  %s876_s7 = inlined_call_operand.vmem [shape: f32[2,4,256], index: 7, kind: output, shape index: {}]  }
   0x1   :  { %v12_v0 = vstv %s875_s6  ;;  %s817_s28 = smov 0  }
   0x2   :  { %13 = vst [vmem:[#allocation2] sm:$0x1] %v12_v0 }
   0x3 LB: > { %s31_s6 = sadd.s32 1, %s762_s27  ;;  %p687_p0 = scmp.ge.s32.totalorder %s766_s28, 1  ;;  %s766_s28 = sphi %s817_s28, %s19_s28   ;;  %s762_s27 = sphi %s815_s27, %s878_s27   ;;  %s758_s26 = sphi %s813_s26, %s877_s26  }
   0x4   : > { %p33_p1 = scmp.ge.s32.totalorder %s31_s6, 2  ;;  %p277_p2 = scmp.lt.s32.totalorder %s766_s28, 3 }
   0x6   : > { %s880_s6 = smov (%p33_p1, %s31_s6), 0  ;;  %p278_p3 = pnand %p687_p0, %p277_p2 }
   0x7   : > { %p327_p4 = scmp.lt.s32.totalorder (!%p278_p3), %s758_s26, 1  ;;  %v768_v1 = vmov (!%p278_p3), 0.0   ;;  %v518_v2 = vld [vmem:[%s873_s4] sm:$0xff] (!%p278_p3)  ;;  %v769_v4 = vmov (!%p278_p3), 0   ;;  %vm442_vm0 = vcmask (!%p278_p3), 1043456   ;;  %vm361_vm1 = vcmask (!%p278_p3), 64512  }
   0x8   : > { %281 = sbr.rel (%p278_p3) target bundleno = 290 (0x122), region = 48  ;;  %429 = vmatprep.mubr.f32.mxu1 (!%p278_p3), %v768_v1  ;;  %511 = vmatprep.mubr.f32.mxu0 (!%p278_p3), %v768_v1  ;;  %v528_v5 = vld [vmem:[%s874_s5] sm:$0xff] (!%p278_p3)  ;;  %vm438_vm2 = vcmask (!%p278_p3), 31744   ;;  %v554_v22 = vlaneseq (!%p278_p3) }
   0x9   : > { %v548_v3 = vld [vmem:[#allocation2] sm:$0x1] (!%p278_p3)  ;;  %733 = vset.pattern.permute.xlu0 (!%p278_p3), %v769_v4  ;;  %734 = vset.pattern.permute.xlu1 (!%p278_p3), %v769_v4 }
   0xa   : > { %521 = vperm.xlu0 (!%p278_p3), %733, %v518_v2   ;;  %551 = vperm.xlu1 (!%p278_p3), %734, %v548_v3   ;;  %v360_v6 = vld [vmem:[%s872_s3] sm:$0xff] (!%p278_p3)  ;;  %v555_v28 = vshrl.u32 (!%p278_p3), %v554_v22, 7 }
   0xb   : > { %v359_v11 = vld [vmem:[%s871_s2] sm:$0xff] (!%p278_p3) }
   0xc   : > { %v556_v33 = vsub.s32 (!%p278_p3), 0, %v555_v28 }
   0xe   : > { %531 = vperm.xlu0 (!%p278_p3), %733, %v528_v5  }
   0xf   : > { %s882_s26 = smov (!%p327_p4, %s758_s26), 1 }
  0x10   : > { %s703_s8 = sshll.u32 %s882_s26, 4  ;;  %s702_s9 = sshll.u32 %s882_s26, 3 }
  0x11   : > { %s344_s14 = scalar_lea.vmem %s870_s1, %s703_s8  ;;  %s334_s17 = scalar_lea.vmem %s869_s0, %s702_s9 }
  0x12   : > { %v358_v7 = vld [vmem:[%s344_s14 + $0x8] sm:$0xff]  ;;  %v357_v8 = vld [vmem:[%s344_s14] sm:$0xff]  ;;  %s354_s24 = scalar_lea.vmem %s876_s7, %s702_s9 }
  0x13   : > { %v356_v9 = vld [vmem:[%s334_s17] sm:$0xff]  ;;  %365 = vmatprep.subr.mxu1 %v358_v7 }
  0x14   : > { %v437_v10 = vcombine.high %v356_v9, %v356_v9  ;;  %366 = vmatpush1.msra.mxu1 %v357_v8 }
  0x15   : > { %694 = vmatmul.mubr.msk.f32.vlgmr.msra.gmra.mrb[0].mxu1 %vm361_vm1, %v360_v6 }
  0x16   : > { %695 = vmatprep.subr.msk.mxu0 %vm442_vm0, %v437_v10 }
  0x17   : > { %696 = vmatpush1.msk.msra.mxu0 %vm442_vm0, %v356_v9 }
  0x18   : > { %697 = vmatmul.mubr.msk.f32.vlgmr.msra.gmra.mrb[0].mxu0 %vm438_vm2, %v359_v11 }
  0x89   : > { %v522_v14 = vpop.permute.xlu0 %521  ;;  %v552_v35 = vpop.permute.xlu1 %551 }
  0x8a   : > { %v557_v39 = vrot.slane %v552_v35, %v556_v33 }
  0x8d   : > { %v532_v23 = vpop.permute.xlu0 %531 }
  0xe8   : > { %v431_v12 = vpop.f32.mrb[0].mxu1 }
  0xe9   : > { %v433_v13 = vpop.f32.mrb[1].mxu1 }
  0xeb   : > { %v513_v15 = vpop.f32.mrb[0].mxu0 }
  0xec   : > { %v514_v16 = vadd.f32 %v513_v15, %v431_v12  ;;  %v515_v17 = vpop.f32.mrb[1].mxu0 }
  0xed   : > { %v516_v18 = vadd.f32 %v515_v17, %v433_v13 }
  0xee   : > { %v524_v19 = vadd.f32 %v522_v14, %v514_v16 }
  0xef   : > { %v525_v20 = vadd.f32 %v522_v14, %v516_v18 }
  0xf0   : > { %v526_v21 = vmax.f32 %v524_v19, 0.0 }
  0xf1   : > { %v527_v24 = vmax.f32 %v525_v20, 0.0 }
  0xf2   : > { %v534_v25 = vmul.f32 %v532_v23, %v526_v21 }
  0xf3   : > { %v535_v26 = vmul.f32 %v532_v23, %v527_v24 }
  0xf4   : > { %v536_v27 = vrot.slane %v534_v25, 4 }
  0xf5   : > { %v542_v29 = vrot.slane %v535_v26, 4 }
  0xf6   : > { %v537_v30 = vadd.f32 %v536_v27, %v534_v25 }
  0xf7   : > { %v543_v31 = vadd.f32 %v542_v29, %v535_v26 }
  0xf8   : > { %v538_v32 = vrot.slane %v537_v30, 2 }
  0xf9   : > { %v544_v34 = vrot.slane %v543_v31, 2 }
  0xfa   : > { %v539_v36 = vadd.f32 %v538_v32, %v537_v30 }
  0xfb   : > { %v545_v37 = vadd.f32 %v544_v34, %v543_v31 }
  0xfc   : > { %v540_v38 = vrot.slane %v539_v36, 1 }
  0xfd   : > { %v546_v40 = vrot.slane %v545_v37, 1 }
  0xfe   : > { %v541_v41 = vadd.f32 %v540_v38, %v539_v36 }
  0xff   : > { %v547_v42 = vadd.f32 %v546_v40, %v545_v37 }
 0x100   : > { %v558_v43 = vadd.f32 %v557_v39, %v541_v41 }
 0x101   : > { %v559_v44 = vadd.f32 %v557_v39, %v547_v42 }
 0x102   : > { %v698_v45 = vmul.f32 -1.442695, %v558_v43 }
 0x103   : > { %v699_v46 = vmul.f32 -1.442695, %v559_v44 }
 0x104   : > { %736 = vpow2.f32 %v698_v45 }
 0x105   : > { %738 = vpow2.f32 %v699_v46 }
 0x10e   : > { %v737_v47 = vpop.eup %736 }
 0x10f   : > { %v739_v48 = vpop.eup %738  ;;  %v566_v49 = vadd.f32 1.0, %v737_v47 }
 0x110   : > { %v567_v50 = vadd.f32 1.0, %v739_v48 }
 0x111   : > { %740 = vrcp.f32 %v566_v49 }
 0x112   : > { %742 = vrcp.f32 %v567_v50 }
 0x11b   : > { %v741_v51 = vpop.eup %740 }
 0x11c   : > { %v743_v52 = vpop.eup %742 }
 0x11d   : > { %v574_v53 = vcombine.low %v741_v51, %v743_v52 }
 0x11f   : > { %v576_v54 = vmul.f32 %v574_v53, %v356_v9 }
 0x121   : > { %577 = vst [vmem:[%s354_s24] sm:$0xff] %v576_v54 }
 0x122 PF: > { %s19_s28 = sadd.s32 1, %s766_s28   ;;  %s877_s26 = smov %s762_s27 }
 0x123   : > { %p16_p5 = scmp.ge.s32.totalorder %s19_s28, 4   ;;  %s878_s27 = smov %s880_s6 }
 0x125   :  { %18 = sbr.rel (!%p16_p5) target bundleno = 3 (0x3), region = 81 }

</bundles_post_ra>
